<compile_context>
chip_gen: v7x
topology: tpu7x:2x2x1
jax: 0.10.0
libtpu: 0.0.40
codegen_flags: <defaults>
</compile_context>

<pallas_src>
import functools

import jax
import jax.numpy as jnp
import numpy as np
from jax.experimental import pallas as pl
from jax.experimental.pallas import tpu as pltpu


# ---------------------------------------------------------------------------
# Kernels
# ---------------------------------------------------------------------------

def _fused_kernel(x_ref, s_ref, o_ref):
    """x_ref: (TB, H*W); s_ref: (H*W, H_out*W_out) one-hot; o_ref: (TB, H_out*W_out)."""
    x = x_ref[...].astype(s_ref.dtype)
    y = jnp.dot(x, s_ref[...], preferred_element_type=jnp.float32)
    o_ref[...] = y.astype(o_ref.dtype)            # single dense, lane-wide store


def _general_kernel(x_ref, c_ref, o_ref, *, tb, h, h_out, src_h):
    """x_ref: (TB*H, W); c_ref: (W, W_out) one-hot; o_ref: (TB*H_out, W_out)."""
    w_out = o_ref.shape[-1]
    # W-axis nearest selection: one large-M MXU matmul for all TB planes.
    x = x_ref[...].astype(c_ref.dtype)
    cols = jnp.dot(x, c_ref[...], preferred_element_type=jnp.float32)
    cols = cols.astype(o_ref.dtype).reshape(tb, h, w_out)

    # H-axis nearest replication, assembled in registers (no per-row stores).
    if src_h == tuple(range(h)):                                   # identity
        rep = cols
    elif h_out % h == 0 and all(s == o // (h_out // h) for o, s in enumerate(src_h)):
        k = h_out // h                                             # integer scale
        rep = jnp.broadcast_to(cols[:, :, None, :], (tb, h, k, w_out))
        rep = rep.reshape(tb, h_out, w_out)
    else:                                                          # arbitrary ratio
        rep = jnp.concatenate([cols[:, s:s + 1, :] for s in src_h], axis=1)

    o_ref[...] = rep.reshape(tb * h_out, w_out)   # single dense full-block store


# ---------------------------------------------------------------------------
# Wrapper helpers
# ---------------------------------------------------------------------------

def _padded_bytes(rows, cols, itemsize):
    """VMEM footprint of a (rows, cols) tile: lanes pad to 128, sublanes pad to
    the dtype tile (8 for 4-byte, 16 for 2-byte, 32 for 1-byte)."""
    sub = max(8, 32 // itemsize)
    return (-(-rows // sub) * sub) * (-(-cols // 128) * 128) * itemsize


def _vmem_budgets():
    """(per-step block budget, vmem_limit_bytes), generation aware."""
    try:
        cap = int(pltpu.get_tpu_info().vmem_capacity_bytes)
    except Exception:
        cap = 64 * 1024 * 1024        # conservative fallback: v7x physical VMEM
    budget = min(cap // 3, 32 * 1024 * 1024)
    limit = min(int(cap * 0.6), 64 * 1024 * 1024)
    return budget, limit


def _choose_tb(nc, valid, step_bytes, budget, plane_hbm_bytes):
    """Planes per grid step: a divisor of nc (no wrapper pad / output slice)."""
    divs = sorted({d for i in range(1, int(nc ** 0.5) + 1) if nc % i == 0
                   for d in (i, nc // i)})
    cands = [d for d in divs if valid(d)]          # d == nc is always valid
    fitting = [d for d in cands if step_bytes(d) <= budget] or cands[:1]

    def score(d):
        steps = nc // d
        # Never shrink a step below ~1 MiB of HBM traffic (per-step overhead),
        # prefer >=2 steps (v7x megacore), ~4 steps (pipeline overlap), an even
        # step count (both TensorCores finish together), then the biggest block.
        traffic_ok = d * plane_hbm_bytes >= (1 << 20) or steps <= 2
        return (traffic_ok, steps >= 2, min(steps, 4), steps % 2 == 0, d)

    return max(fitting, key=score)


# ---------------------------------------------------------------------------
# Public entry point (== F.interpolate(x, size=shape, mode='nearest'), NCHW)
# ---------------------------------------------------------------------------

def upsample_nearest(x, shape):
    N, C, H, W = x.shape
    H_out, W_out = int(shape[0]), int(shape[1])
    NC = N * C
    isz = jnp.dtype(x.dtype).itemsize

    # One-hot operands in a float dtype the MXU selects exactly with (0/1).
    mat_dtype = x.dtype if jnp.issubdtype(x.dtype, jnp.floating) else jnp.float32
    misz = jnp.dtype(mat_dtype).itemsize

    # PyTorch mode='nearest' (legacy): src = floor(dst * in / out).
    src_h = tuple(int(o * H // H_out) for o in range(H_out))
    src_w = (np.arange(W_out) * W) // W_out

    budget, vmem_limit = _vmem_budgets()
    plane_hbm = (H * W + H_out * W_out) * isz
    fused_sel_bytes = _padded_bytes(H * W, H_out * W_out, misz)

    if fused_sel_bytes <= 2 * 1024 * 1024:
        # ---- Fused fast path: one one-hot matmul selects along H and W at
        # once; output block is 2-D and lane-dense (last dim H_out*W_out).
        rh = (np.arange(H)[:, None] == np.asarray(src_h)[None, :]).astype(np.float32)
        cw = (np.arange(W)[:, None] == src_w[None, :]).astype(np.float32)
        # sel[h*W + w, o*W_out + p] = [h == src_h[o]] * [w == src_w[p]]
        sel = jnp.asarray(np.kron(rh, cw), dtype=mat_dtype)

        def step_bytes(d):
            return (2 * _padded_bytes(d, H * W, isz)            # input block (x2 buf)
                    + 2 * fused_sel_bytes                        # constant (x2 buf)
                    + 2 * _padded_bytes(d, H_out * W_out, isz)   # output block
                    + 2 * _padded_bytes(d, H_out * W_out, 4))    # f32 acc + cast

        def valid(d):  # (8,128) rule on the second-minor block dim
            return d == NC or d % 8 == 0

        TB = _choose_tb(NC, valid, step_bytes, budget, plane_hbm)
        out = pl.pallas_call(
            _fused_kernel,
            out_shape=jax.ShapeDtypeStruct((NC, H_out * W_out), x.dtype),
            grid_spec=pltpu.PrefetchScalarGridSpec(
                num_scalar_prefetch=0,
                grid=(NC // TB,),
                in_specs=[
                    pl.BlockSpec((TB, H * W), lambda b: (b, 0)),
                    pl.BlockSpec((H * W, H_out * W_out), lambda b: (0, 0)),
                ],
                out_specs=pl.BlockSpec((TB, H_out * W_out), lambda b: (b, 0)),
            ),
            compiler_params=pltpu.CompilerParams(
                dimension_semantics=("parallel",),
                vmem_limit_bytes=vmem_limit,
            ),
        )(x.reshape(NC, H * W), sel)
        return out.reshape(N, C, H_out, W_out)

    # ---- General path: W selection on the MXU, H replication in registers,
    # one dense 2-D (TB*H_out, W_out) store per grid step.
    cw = jnp.asarray((np.arange(W)[:, None] == src_w[None, :]).astype(np.float32),
                     dtype=mat_dtype)

    def step_bytes(d):
        return (2 * _padded_bytes(d * H, W, isz)                 # input block
                + 2 * _padded_bytes(W, W_out, misz)              # constant
                + 2 * _padded_bytes(d * H_out, W_out, isz)       # output block
                + _padded_bytes(d * H, W_out, 4)                 # f32 cols
                + _padded_bytes(d * H, W_out, isz)               # cast cols
                + 2 * _padded_bytes(d * H_out, W_out, isz))      # assembled block

    def valid(d):
        return d == NC or ((d * H) % 8 == 0 and (d * H_out) % 8 == 0)

    TB = _choose_tb(NC, valid, step_bytes, budget, plane_hbm)
    kernel = functools.partial(_general_kernel, tb=TB, h=H, h_out=H_out, src_h=src_h)
    out = pl.pallas_call(
        kernel,
        out_shape=jax.ShapeDtypeStruct((NC * H_out, W_out), x.dtype),
        grid_spec=pltpu.PrefetchScalarGridSpec(
            num_scalar_prefetch=0,
            grid=(NC // TB,),
            in_specs=[
                pl.BlockSpec((TB * H, W), lambda b: (b, 0)),
                pl.BlockSpec((W, W_out), lambda b: (0, 0)),
            ],
            out_specs=pl.BlockSpec((TB * H_out, W_out), lambda b: (b, 0)),
        ),
        compiler_params=pltpu.CompilerParams(
            dimension_semantics=("parallel",),
            vmem_limit_bytes=vmem_limit,
        ),
    )(x.reshape(NC * H, W), cw)
    return out.reshape(N, C, H_out, W_out)


if __name__ == "__main__":
    key = jax.random.PRNGKey(0)
    N, C, H, W = 2, 4, 16, 16
    out_hw = (32, 24)  # target (H_out, W_out)

    x = jax.random.normal(key, (N, C, H, W), dtype=jnp.float32)

    y = jax.block_until_ready(upsample_nearest(x, out_hw))

    # Pure-numpy reference: nearest-neighbour gather (PyTorch mode='nearest').
    src_h = (np.arange(out_hw[0]) * H) // out_hw[0]
    src_w = (np.arange(out_hw[1]) * W) // out_hw[1]
    ref = np.asarray(x)[:, :, src_h[:, None], src_w[None, :]]

    assert y.shape == (N, C, out_hw[0], out_hw[1])
    np.testing.assert_allclose(np.asarray(y), ref, rtol=0, atol=0)

    print("KERNEL_OK")
</pallas_src>

<mosaic_0001>
module attributes {stable_mosaic.version = 11 : i64} {
  func.func @_fused_kernel(%arg0: i32, %arg1: memref<8x256xf32, #tpu.memory_space<vmem>>, %arg2: memref<256x768xf32, #tpu.memory_space<vmem>>, %arg3: memref<8x768xf32, #tpu.memory_space<vmem>>) attributes {dimension_semantics = [#tpu.dimension_semantics<parallel>], iteration_bounds = array<i64: 1>, scalar_prefetch = 0 : i64, scratch_operands = 0 : i64, tpu.core_type = #tpu.core_type<tc>, window_params = [{transform_indices = @transform_0, window_bounds = array<i64: 8, 256>}, {pipeline_mode = #tpu.pipeline_mode<synchronous>, transform_indices = @transform_1, window_bounds = array<i64: 256, 768>}, {transform_indices = @transform_2, window_bounds = array<i64: 8, 768>}]} {
    %c0 = arith.constant 0 : index
    %c0_0 = arith.constant 0 : index
    %0 = vector.load %arg1[%c0, %c0_0] : memref<8x256xf32, #tpu.memory_space<vmem>>, vector<8x256xf32>
    %c0_1 = arith.constant 0 : index
    %c0_2 = arith.constant 0 : index
    %1 = vector.load %arg2[%c0_1, %c0_2] : memref<256x768xf32, #tpu.memory_space<vmem>>, vector<256x768xf32>
    %cst = arith.constant dense<0.000000e+00> : vector<8x768xf32>
    %2 = tpu.matmul %0, %1, %cst {dimension_numbers = #tpu.dot_dimension_numbers<[1], [0], [0], [1], [0, 0, 1, 1], [], []>} : vector<8x256xf32>, vector<256x768xf32>, vector<8x768xf32> -> vector<8x768xf32>
    %c0_3 = arith.constant 0 : index
    %c0_4 = arith.constant 0 : index
    %3 = vector.load %arg3[%c0_3, %c0_4] : memref<8x768xf32, #tpu.memory_space<vmem>>, vector<8x768xf32>
    tpu.vector_store %arg3[%c0_3, %c0_4], %2 {strides = array<i32>} : memref<8x768xf32, #tpu.memory_space<vmem>>, vector<8x768xf32>,
    return
  }
  func.func @transform_0(%arg0: i32) -> (i32, i32) {
    %c0_i32 = arith.constant 0 : i32
    %c0_i32_0 = arith.constant 0 : i32
    return %arg0, %c0_i32 : i32, i32
  }
  func.func @transform_1(%arg0: i32) -> (i32, i32) {
    %c0_i32 = arith.constant 0 : i32
    %c0_i32_0 = arith.constant 0 : i32
    %c0_i32_1 = arith.constant 0 : i32
    return %c0_i32, %c0_i32_0 : i32, i32
  }
  func.func @transform_2(%arg0: i32) -> (i32, i32) {
    %c0_i32 = arith.constant 0 : i32
    %c0_i32_0 = arith.constant 0 : i32
    return %arg0, %c0_i32 : i32, i32
  }
}

</mosaic_0001>

<bundles_post_ra>
// kernel: tpu_custom_call.1
= control target key start
LH: loop header
LB: loop body
LE: loop exit
PB: predicated region body
PF: predicated region fallthrough
CT: control target
= control target key end

     0   :  { %7 = vsyncpa [#allocation3], 0  ;;  %s809_s0 = inlined_call_operand.hbm [shape: f32[8,256], index: 0, kind: input, shape index: {}]   ;;  %s810_s1 = inlined_call_operand.hbm [shape: f32[256,768], index: 1, kind: input, shape index: {}]   ;;  %s811_s2 = inlined_call_operand.hbm [shape: f32[8,768], index: 2, kind: output, shape index: {}]  }
   0x1   :  { %8 = vsyncpa [#allocation6], 0 }
   0x2   :  { %9 = vsyncpa [#allocation4], 0  ;;  %s736_s9 = smov [#allocation2]   ;;  %s737_s11 = smov [#allocation5]  }
   0x3   :  { %s16_s10 = sshll.u32 %s736_s9, 4  ;;  %s25_s12 = sshll.u32 %s737_s11, 4  ;;  %s17_s10 = int_to_ptr.vmem [resolvable:$true] %s16_s10  ;;  %s756_s12 = int_to_ptr.vmem [resolvable:$true] %s25_s12 }
   0x4   :  { %s664_s15 = scalar_lea.hbm %s809_s0, 256 }
   0x5   :  { %p665_p0 = scmp.ne.s32.totalorder %s809_s0, %s664_s15  ;;  %p668_p1 = scmp.lt.u32.totalorder %s664_s15, %s809_s0 }
   0x7   :  { %p670_p2 = pnand %p668_p1, %p665_p0 }
   0x9   :  { %673 = shalt.err (!%p670_p2)
}
   0xa   :  { %s674_s20 = scalar_lea.vmem %s17_s10, 256  ;;  %p679_p4 = scmp.lt.s32.totalorder %s17_s10, %s17_s10 }
   0xb   :  { %p675_p3 = scmp.ne.s32.totalorder %s17_s10, %s674_s20  ;;  %p680_p5 = scmp.lt.s32.totalorder %s674_s20, %s674_s20 }
   0xd   :  { %p681_p6 = por %p680_p5, %p679_p4 }
   0xf   :  { %p682_p7 = pnand %p681_p6, %p675_p3 }
  0x11   :  { %685 = shalt.err (!%p682_p7)
}
  0x12   :  { %19 = dma.hbm_to_vmem [thread:$0]  %s809_s0, 256, %s17_s10, [#allocation3]  }
  0x13   :  { %s686_s25 = scalar_lea.hbm %s810_s1, 24576 }
  0x14   :  { %p687_p8 = scmp.ne.s32.totalorder %s810_s1, %s686_s25  ;;  %p690_p9 = scmp.lt.u32.totalorder %s686_s25, %s810_s1 }
  0x16   :  { %p692_p10 = pnand %p690_p9, %p687_p8 }
  0x18   :  { %695 = shalt.err (!%p692_p10)
}
  0x19   :  { %s696_s30 = scalar_lea.vmem %s756_s12, 24576  ;;  %p701_p12 = scmp.lt.s32.totalorder %s756_s12, %s756_s12 }
  0x1a   :  { %p697_p11 = scmp.ne.s32.totalorder %s756_s12, %s696_s30  ;;  %p702_p13 = scmp.lt.s32.totalorder %s696_s30, %s696_s30 }
  0x1c   :  { %p703_p0 = por %p702_p13, %p701_p12 }
  0x1e   :  { %p704_p1 = pnand %p703_p0, %p697_p11 }
  0x20   :  { %707 = shalt.err (!%p704_p1)
}
  0x21   :  { %s738_s0 = smov 768   ;;  %s739_s3 = smov 48  }
  0x22   :  { %31 = dma.hbm_to_vmem [thread:$0]  %s810_s1, 24576, %s756_s12, [#allocation6], %s738_s0, %s738_s0, %s739_s3  }
  0x23   :  { %730 = dma.done.wait [#allocation3], 256  }
  0x24   :  { %731 = vsyncadd [#allocation3], 4294967040 }
  0x25   :  { %732 = dma.done.wait [#allocation6], 24576  }
  0x26   :  { %733 = vsyncadd [#allocation6], 4294942720  ;;  %v41_v0 = vld [vmem:[#allocation5 + $0x8] sm:$0xff]  ;;  %v47_v1 = vld [vmem:[#allocation5 + $0x38] sm:$0xff]  ;;  %s740_s1 = smov [#allocation7]  }
  0x27   :  { %v40_v2 = vld [vmem:[#allocation5] sm:$0xff]  ;;  %v467_v3 = vpack.c.bf16 %v47_v1, %v41_v0  ;;  %v46_v4 = vld [vmem:[#allocation5 + $0x30] sm:$0xff]  ;;  %v53_v5 = vld [vmem:[#allocation5 + $0x68] sm:$0xff]  ;;  %s457_s6 = sshll.u32 %s740_s1, 4  ;;  %s458_s6 = int_to_ptr.vmem [resolvable:$true] %s457_s6 }
  0x28   :  { %v59_v6 = vld [vmem:[#allocation5 + $0x98] sm:$0xff]  ;;  %v469_v7 = vpack.c.bf16 %v46_v4, %v40_v2  ;;  %v52_v9 = vld [vmem:[#allocation5 + $0x60] sm:$0xff]  ;;  %v58_v10 = vld [vmem:[#allocation5 + $0x90] sm:$0xff]  ;;  %s708_s7 = scalar_lea.vmem %s458_s6, 768  ;;  %p713_p3 = scmp.lt.s32.totalorder %s458_s6, %s458_s6 }
  0x29   :  { %v471_v8 = vpack.c.bf16 %v59_v6, %v53_v5  ;;  %v65_v11 = vld [vmem:[#allocation5 + $0xc8] sm:$0xff]  ;;  %468 = vmatprep.subr.bf16.mxu0 %v467_v3  ;;  %v71_v12 = vld [vmem:[#allocation5 + $0xf8] sm:$0xff]  ;;  %v473_v13 = vpack.c.bf16 %v58_v10, %v52_v9  ;;  %v64_v15 = vld [vmem:[#allocation5 + $0xc0] sm:$0xff]  ;;  %p709_p2 = scmp.ne.s32.totalorder %s458_s6, %s708_s7  ;;  %p714_p4 = scmp.lt.s32.totalorder %s708_s7, %s708_s7 }
  0x2a   :  { %470 = vmatpush1.bf16.msra.mxu0 %v469_v7  ;;  %v475_v14 = vpack.c.bf16 %v71_v12, %v65_v11  ;;  %v70_v16 = vld [vmem:[#allocation5 + $0xf0] sm:$0xff]  ;;  %v77_v17 = vld [vmem:[#allocation5 + $0x128] sm:$0xff]  ;;  %v83_v18 = vld [vmem:[#allocation5 + $0x158] sm:$0xff] }
  0x2b   :  { %472 = vmatprep.subr.bf16.mxu0 %v471_v8  ;;  %v477_v19 = vpack.c.bf16 %v70_v16, %v64_v15  ;;  %v479_v20 = vpack.c.bf16 %v83_v18, %v77_v17  ;;  %v76_v21 = vld [vmem:[#allocation5 + $0x120] sm:$0xff]  ;;  %v82_v22 = vld [vmem:[#allocation5 + $0x150] sm:$0xff]  ;;  %v89_v23 = vld [vmem:[#allocation5 + $0x188] sm:$0xff]  ;;  %p715_p5 = por %p714_p4, %p713_p3 }
  0x2c   :  { %v95_v24 = vld [vmem:[#allocation5 + $0x1b8] sm:$0xff]  ;;  %v481_v25 = vpack.c.bf16 %v82_v22, %v76_v21  ;;  %v88_v27 = vld [vmem:[#allocation5 + $0x180] sm:$0xff]  ;;  %v94_v28 = vld [vmem:[#allocation5 + $0x1b0] sm:$0xff] }
  0x2d   :  { %v483_v26 = vpack.c.bf16 %v95_v24, %v89_v23  ;;  %v101_v29 = vld [vmem:[#allocation5 + $0x1e8] sm:$0xff]  ;;  %v107_v30 = vld [vmem:[#allocation5 + $0x218] sm:$0xff]  ;;  %v485_v31 = vpack.c.bf16 %v94_v28, %v88_v27  ;;  %v100_v33 = vld [vmem:[#allocation5 + $0x1e0] sm:$0xff]  ;;  %p716_p6 = pnand %p715_p5, %p709_p2 }
  0x2e   :  { %474 = vmatpush1.bf16.msra.mxu0 %v473_v13  ;;  %v487_v32 = vpack.c.bf16 %v107_v30, %v101_v29  ;;  %v106_v34 = vld [vmem:[#allocation5 + $0x210] sm:$0xff]  ;;  %v113_v35 = vld [vmem:[#allocation5 + $0x248] sm:$0xff]  ;;  %v119_v36 = vld [vmem:[#allocation5 + $0x278] sm:$0xff] }
  0x2f   :  { %476 = vmatprep.subr.bf16.mxu0 %v475_v14  ;;  %v489_v37 = vpack.c.bf16 %v106_v34, %v100_v33  ;;  %v112_v38 = vld [vmem:[#allocation5 + $0x240] sm:$0xff]  ;;  %v118_v39 = vld [vmem:[#allocation5 + $0x270] sm:$0xff]  ;;  %v491_v40 = vpack.c.bf16 %v119_v36, %v113_v35  ;;  %v125_v41 = vld [vmem:[#allocation5 + $0x2a8] sm:$0xff] }
  0x30   :  { %v787_v42 = vld [vmem:[#allocation2 + $0x8] sm:$0xff]  ;;  %v49_v45 = vld [vmem:[#allocation5 + $0x48] sm:$0xff]  ;;  %v42_v46 = vld [vmem:[#allocation5 + $0x10] sm:$0xff]  ;;  %v493_v49 = vpack.c.bf16 %v118_v39, %v112_v38 }
  0x31   :  { %v43_v43 = vld [vmem:[#allocation5 + $0x18] sm:$0xff]  ;;  %296 = vmatprep.mubr.f32.mxu0 %v787_v42  ;;  %367 = vmatprep.mubr.f32.mxu1 %v787_v42  ;;  %v48_v48 = vld [vmem:[#allocation5 + $0x40] sm:$0xff]  ;;  %v130_v51 = vld [vmem:[#allocation5 + $0x2d0] sm:$0xff] }
  0x32   :  { %478 = vmatpush1.bf16.msra.mxu0 %v477_v19  ;;  %v131_v44 = vld [vmem:[#allocation5 + $0x2d8] sm:$0xff]  ;;  %v531_v47 = vpack.c.bf16 %v49_v45, %v43_v43  ;;  %v124_v50 = vld [vmem:[#allocation5 + $0x2a0] sm:$0xff]  ;;  %v533_v52 = vpack.c.bf16 %v48_v48, %v42_v46  ;;  %v61_v55 = vld [vmem:[#allocation5 + $0xa8] sm:$0xff] }
  0x33   :  { %480 = vmatprep.subr.bf16.mxu0 %v479_v20  ;;  %v55_v53 = vld [vmem:[#allocation5 + $0x78] sm:$0xff]  ;;  %v495_v54 = vpack.c.bf16 %v131_v44, %v125_v41  ;;  %v54_v56 = vld [vmem:[#allocation5 + $0x70] sm:$0xff]  ;;  %v60_v57 = vld [vmem:[#allocation5 + $0xa0] sm:$0xff]  ;;  %v497_v0 = vpack.c.bf16 %v130_v51, %v124_v50 }
  0x34   :  { %532 = vmatprep.subr.bf16.mxu1 %v531_v47  ;;  %v137_v58 = vld [vmem:[#allocation5 + $0x308] sm:$0xff]  ;;  %v143_v59 = vld [vmem:[#allocation5 + $0x338] sm:$0xff]  ;;  %v535_v60 = vpack.c.bf16 %v61_v55, %v55_v53  ;;  %v537_v61 = vpack.c.bf16 %v60_v57, %v54_v56  ;;  %v66_v2 = vld [vmem:[#allocation5 + $0xd0] sm:$0xff] }
  0x35   :  { %534 = vmatpush1.bf16.msra.mxu1 %v533_v52  ;;  %v67_v62 = vld [vmem:[#allocation5 + $0xd8] sm:$0xff]  ;;  %v73_v63 = vld [vmem:[#allocation5 + $0x108] sm:$0xff]  ;;  %v72_v3 = vld [vmem:[#allocation5 + $0x100] sm:$0xff]  ;;  %v499_v4 = vpack.c.bf16 %v143_v59, %v137_v58 }
  0x36   :  { %482 = vmatpush1.bf16.msra.mxu0 %v481_v25  ;;  %536 = vmatprep.subr.bf16.mxu1 %v535_v60  ;;  %v539_v1 = vpack.c.bf16 %v73_v63, %v67_v62  ;;  %v136_v5 = vld [vmem:[#allocation5 + $0x300] sm:$0xff]  ;;  %v142_v6 = vld [vmem:[#allocation5 + $0x330] sm:$0xff]  ;;  %v149_v7 = vld [vmem:[#allocation5 + $0x368] sm:$0xff]  ;;  %v541_v9 = vpack.c.bf16 %v72_v3, %v66_v2 }
  0x37   :  { %484 = vmatprep.subr.bf16.mxu0 %v483_v26  ;;  %v155_v8 = vld [vmem:[#allocation5 + $0x398] sm:$0xff]  ;;  %v85_v11 = vld [vmem:[#allocation5 + $0x168] sm:$0xff]  ;;  %v78_v13 = vld [vmem:[#allocation5 + $0x130] sm:$0xff]  ;;  %v501_v15 = vpack.c.bf16 %v142_v6, %v136_v5 }
  0x38   :  { %v79_v10 = vld [vmem:[#allocation5 + $0x138] sm:$0xff]  ;;  %v84_v14 = vld [vmem:[#allocation5 + $0x160] sm:$0xff]  ;;  %v503_v17 = vpack.c.bf16 %v155_v8, %v149_v7  ;;  %v154_v19 = vld [vmem:[#allocation5 + $0x390] sm:$0xff] }
  0x39   :  { %538 = vmatpush1.bf16.msra.mxu1 %v537_v61  ;;  %v543_v12 = vpack.c.bf16 %v85_v11, %v79_v10  ;;  %v91_v16 = vld [vmem:[#allocation5 + $0x198] sm:$0xff]  ;;  %v148_v18 = vld [vmem:[#allocation5 + $0x360] sm:$0xff]  ;;  %v97_v20 = vld [vmem:[#allocation5 + $0x1c8] sm:$0xff]  ;;  %v545_v23 = vpack.c.bf16 %v84_v14, %v78_v13 }
  0x3a   :  { %486 = vmatpush1.bf16.msra.mxu0 %v485_v31  ;;  %540 = vmatprep.subr.bf16.mxu1 %v539_v1  ;;  %v161_v21 = vld [vmem:[#allocation5 + $0x3c8] sm:$0xff]  ;;  %v167_v22 = vld [vmem:[#allocation5 + $0x3f8] sm:$0xff]  ;;  %v547_v24 = vpack.c.bf16 %v97_v20, %v91_v16  ;;  %v90_v25 = vld [vmem:[#allocation5 + $0x190] sm:$0xff]  ;;  %v505_v27 = vpack.c.bf16 %v154_v19, %v148_v18 }
  0x3b   :  { %488 = vmatprep.subr.bf16.mxu0 %v487_v32  ;;  %v96_v26 = vld [vmem:[#allocation5 + $0x1c0] sm:$0xff]  ;;  %v103_v28 = vld [vmem:[#allocation5 + $0x1f8] sm:$0xff]  ;;  %v109_v29 = vld [vmem:[#allocation5 + $0x228] sm:$0xff]  ;;  %v507_v30 = vpack.c.bf16 %v167_v22, %v161_v21 }
  0x3c   :  { %v160_v31 = vld [vmem:[#allocation5 + $0x3c0] sm:$0xff]  ;;  %v166_v32 = vld [vmem:[#allocation5 + $0x3f0] sm:$0xff]  ;;  %v173_v33 = vld [vmem:[#allocation5 + $0x428] sm:$0xff]  ;;  %v549_v35 = vpack.c.bf16 %v96_v26, %v90_v25  ;;  %v551_v36 = vpack.c.bf16 %v109_v29, %v103_v28 }
  0x3d   :  { %542 = vmatpush1.bf16.msra.mxu1 %v541_v9  ;;  %v179_v34 = vld [vmem:[#allocation5 + $0x458] sm:$0xff]  ;;  %v108_v38 = vld [vmem:[#allocation5 + $0x220] sm:$0xff]  ;;  %v509_v39 = vpack.c.bf16 %v166_v32, %v160_v31  ;;  %v121_v41 = vld [vmem:[#allocation5 + $0x288] sm:$0xff] }
  0x3e   :  { %490 = vmatpush1.bf16.msra.mxu0 %v489_v37  ;;  %544 = vmatprep.subr.bf16.mxu1 %v543_v12  ;;  %v102_v37 = vld [vmem:[#allocation5 + $0x1f0] sm:$0xff]  ;;  %v511_v43 = vpack.c.bf16 %v179_v34, %v173_v33  ;;  %v172_v44 = vld [vmem:[#allocation5 + $0x420] sm:$0xff]  ;;  %v185_v46 = vld [vmem:[#allocation5 + $0x488] sm:$0xff] }
  0x3f   :  { %492 = vmatprep.subr.bf16.mxu0 %v491_v40  ;;  %v115_v40 = vld [vmem:[#allocation5 + $0x258] sm:$0xff]  ;;  %v178_v45 = vld [vmem:[#allocation5 + $0x450] sm:$0xff]  ;;  %v553_v48 = vpack.c.bf16 %v108_v38, %v102_v37  ;;  %v120_v51 = vld [vmem:[#allocation5 + $0x280] sm:$0xff] }
  0x40   :  { %v191_v47 = vld [vmem:[#allocation5 + $0x4b8] sm:$0xff]  ;;  %v114_v50 = vld [vmem:[#allocation5 + $0x250] sm:$0xff]  ;;  %v513_v52 = vpack.c.bf16 %v178_v45, %v172_v44  ;;  %v184_v56 = vld [vmem:[#allocation5 + $0x480] sm:$0xff] }
  0x41   :  { %546 = vmatpush1.bf16.msra.mxu1 %v545_v23  ;;  %v127_v53 = vld [vmem:[#allocation5 + $0x2b8] sm:$0xff]  ;;  %v515_v55 = vpack.c.bf16 %v191_v47, %v185_v46  ;;  %v190_v57 = vld [vmem:[#allocation5 + $0x4b0] sm:$0xff]  ;;  %v197_v58 = vld [vmem:[#allocation5 + $0x4e8] sm:$0xff]  ;;  %v557_v60 = vpack.c.bf16 %v120_v51, %v114_v50 }
  0x42   :  { %494 = vmatpush1.bf16.msra.mxu0 %v493_v49  ;;  %548 = vmatprep.subr.bf16.mxu1 %v547_v24  ;;  %v555_v49 = vpack.c.bf16 %v121_v41, %v115_v40  ;;  %v203_v59 = vld [vmem:[#allocation5 + $0x518] sm:$0xff]  ;;  %v126_v62 = vld [vmem:[#allocation5 + $0x2b0] sm:$0xff]  ;;  %v132_v63 = vld [vmem:[#allocation5 + $0x2e0] sm:$0xff] }
  0x43   :  { %496 = vmatprep.subr.bf16.mxu0 %v495_v54  ;;  %v133_v54 = vld [vmem:[#allocation5 + $0x2e8] sm:$0xff]  ;;  %v139_v1 = vld [vmem:[#allocation5 + $0x318] sm:$0xff]  ;;  %v519_v3 = vpack.c.bf16 %v203_v59, %v197_v58  ;;  %v202_v5 = vld [vmem:[#allocation5 + $0x510] sm:$0xff]  ;;  %v561_v8 = vpack.c.bf16 %v132_v63, %v126_v62 }
  0x44   :  { %v559_v61 = vpack.c.bf16 %v133_v54, %v127_v53  ;;  %v145_v2 = vld [vmem:[#allocation5 + $0x348] sm:$0xff]  ;;  %v215_v7 = vld [vmem:[#allocation5 + $0x578] sm:$0xff]  ;;  %v138_v10 = vld [vmem:[#allocation5 + $0x310] sm:$0xff] }
  0x45   :  { %550 = vmatpush1.bf16.msra.mxu1 %v549_v35  ;;  %v209_v6 = vld [vmem:[#allocation5 + $0x548] sm:$0xff]  ;;  %v563_v9 = vpack.c.bf16 %v145_v2, %v139_v1  ;;  %v144_v11 = vld [vmem:[#allocation5 + $0x340] sm:$0xff]  ;;  %v151_v13 = vld [vmem:[#allocation5 + $0x378] sm:$0xff] }
  0x46   :  { %498 = vmatpush1.bf16.msra.mxu0 %v497_v0  ;;  %552 = vmatprep.subr.bf16.mxu1 %v551_v36  ;;  %v517_v0 = vpack.c.bf16 %v190_v57, %v184_v56  ;;  %v157_v14 = vld [vmem:[#allocation5 + $0x3a8] sm:$0xff]  ;;  %v208_v16 = vld [vmem:[#allocation5 + $0x540] sm:$0xff]  ;;  %v227_v19 = vld [vmem:[#allocation5 + $0x5d8] sm:$0xff]  ;;  %v565_v20 = vpack.c.bf16 %v144_v11, %v138_v10 }
  0x47   :  { %500 = vmatprep.subr.bf16.mxu0 %v499_v4  ;;  %v196_v4 = vld [vmem:[#allocation5 + $0x4e0] sm:$0xff]  ;;  %v221_v18 = vld [vmem:[#allocation5 + $0x5a8] sm:$0xff]  ;;  %v567_v21 = vpack.c.bf16 %v157_v14, %v151_v13  ;;  %v150_v22 = vld [vmem:[#allocation5 + $0x370] sm:$0xff] }
  0x48   :  { %v521_v12 = vpack.c.bf16 %v202_v5, %v196_v4  ;;  %v156_v23 = vld [vmem:[#allocation5 + $0x3a0] sm:$0xff]  ;;  %v163_v25 = vld [vmem:[#allocation5 + $0x3d8] sm:$0xff]  ;;  %v169_v26 = vld [vmem:[#allocation5 + $0x408] sm:$0xff] }
  0x49   :  { %554 = vmatpush1.bf16.msra.mxu1 %v553_v48  ;;  %v220_v28 = vld [vmem:[#allocation5 + $0x5a0] sm:$0xff]  ;;  %v226_v29 = vld [vmem:[#allocation5 + $0x5d0] sm:$0xff]  ;;  %v51_v31 = vld [vmem:[#allocation5 + $0x58] sm:$0xff]  ;;  %v569_v32 = vpack.c.bf16 %v156_v23, %v150_v22  ;;  %v571_v33 = vpack.c.bf16 %v169_v26, %v163_v25 }
  0x4a   :  { %502 = vmatpush1.bf16.msra.mxu0 %v501_v15  ;;  %556 = vmatprep.subr.bf16.mxu1 %v555_v49  ;;  %v523_v15 = vpack.c.bf16 %v215_v7, %v209_v6  ;;  %v162_v34 = vld [vmem:[#allocation5 + $0x3d0] sm:$0xff]  ;;  %v168_v35 = vld [vmem:[#allocation5 + $0x400] sm:$0xff]  ;;  %v529_v36 = vpack.c.bf16 %v226_v29, %v220_v28  ;;  %v175_v37 = vld [vmem:[#allocation5 + $0x438] sm:$0xff] }
  0x4b   :  { %504 = vmatprep.subr.bf16.mxu0 %v503_v17  ;;  %v214_v17 = vld [vmem:[#allocation5 + $0x570] sm:$0xff]  ;;  %v181_v38 = vld [vmem:[#allocation5 + $0x468] sm:$0xff]  ;;  %v44_v40 = vld [vmem:[#allocation5 + $0x20] sm:$0xff]  ;;  %v573_v45 = vpack.c.bf16 %v168_v35, %v162_v34 }
  0x4c   :  { %v525_v24 = vpack.c.bf16 %v214_v17, %v208_v16  ;;  %v50_v41 = vld [vmem:[#allocation5 + $0x50] sm:$0xff]  ;;  %v63_v44 = vld [vmem:[#allocation5 + $0xb8] sm:$0xff]  ;;  %v575_v46 = vpack.c.bf16 %v181_v38, %v175_v37  ;;  %v180_v48 = vld [vmem:[#allocation5 + $0x460] sm:$0xff] }
  0x4d   :  { %558 = vmatpush1.bf16.msra.mxu1 %v557_v60  ;;  %v174_v47 = vld [vmem:[#allocation5 + $0x430] sm:$0xff]  ;;  %v597_v50 = vpack.c.bf16 %v50_v41, %v44_v40  ;;  %v187_v51 = vld [vmem:[#allocation5 + $0x498] sm:$0xff]  ;;  %v56_v54 = vld [vmem:[#allocation5 + $0x80] sm:$0xff] }
  0x4e   :  { %506 = vmatpush1.bf16.msra.mxu0 %v505_v27  ;;  %560 = vmatprep.subr.bf16.mxu1 %v559_v61  ;;  %v527_v27 = vpack.c.bf16 %v227_v19, %v221_v18  ;;  %v791_v49 = vld [vmem:[#allocation2] sm:$0xff]  ;;  %v69_v56 = vld [vmem:[#allocation5 + $0xe8] sm:$0xff]  ;;  %v75_v57 = vld [vmem:[#allocation5 + $0x118] sm:$0xff]  ;;  %v577_v58 = vpack.c.bf16 %v180_v48, %v174_v47 }
  0x4f   :  { %508 = vmatprep.subr.bf16.mxu0 %v507_v30  ;;  %v45_v30 = vld [vmem:[#allocation5 + $0x28] sm:$0xff]  ;;  %v186_v60 = vld [vmem:[#allocation5 + $0x490] sm:$0xff]  ;;  %v192_v61 = vld [vmem:[#allocation5 + $0x4c0] sm:$0xff]  ;;  %v603_v1 = vpack.c.bf16 %v75_v57, %v69_v56 }
  0x50   :  { %v199_v63 = vld [vmem:[#allocation5 + $0x4f8] sm:$0xff]  ;;  %v68_v2 = vld [vmem:[#allocation5 + $0xe0] sm:$0xff]  ;;  %v81_v4 = vld [vmem:[#allocation5 + $0x148] sm:$0xff]  ;;  %v581_v6 = vpack.c.bf16 %v192_v61, %v186_v60 }
  0x51   :  { %562 = vmatpush1.bf16.msra.mxu1 %v561_v8  ;;  %v87_v5 = vld [vmem:[#allocation5 + $0x178] sm:$0xff]  ;;  %v198_v8 = vld [vmem:[#allocation5 + $0x4f0] sm:$0xff]  ;;  %v80_v14 = vld [vmem:[#allocation5 + $0x140] sm:$0xff] }
  0x52   :  { %510 = vmatpush1.bf16.msra.mxu0 %v509_v39  ;;  %564 = vmatprep.subr.bf16.mxu1 %v563_v9  ;;  %v595_v39 = vpack.c.bf16 %v51_v31, %v45_v30  ;;  %v204_v9 = vld [vmem:[#allocation5 + $0x520] sm:$0xff]  ;;  %v211_v11 = vld [vmem:[#allocation5 + $0x558] sm:$0xff]  ;;  %v607_v13 = vpack.c.bf16 %v87_v5, %v81_v4  ;;  %v210_v19 = vld [vmem:[#allocation5 + $0x550] sm:$0xff] }
  0x53   :  { %512 = vmatprep.subr.bf16.mxu0 %v511_v43  ;;  %v57_v43 = vld [vmem:[#allocation5 + $0x88] sm:$0xff]  ;;  %v99_v16 = vld [vmem:[#allocation5 + $0x1d8] sm:$0xff]  ;;  %v585_v17 = vpack.c.bf16 %v204_v9, %v198_v8  ;;  %v92_v25 = vld [vmem:[#allocation5 + $0x1a0] sm:$0xff] }
  0x54   :  { %v599_v53 = vpack.c.bf16 %v63_v44, %v57_v43  ;;  %v223_v22 = vld [vmem:[#allocation5 + $0x5b8] sm:$0xff]  ;;  %v229_v23 = vld [vmem:[#allocation5 + $0x5e8] sm:$0xff]  ;;  %v98_v26 = vld [vmem:[#allocation5 + $0x1d0] sm:$0xff] }
  0x55   :  { %566 = vmatpush1.bf16.msra.mxu1 %v565_v20  ;;  %v216_v20 = vld [vmem:[#allocation5 + $0x580] sm:$0xff]  ;;  %v111_v28 = vld [vmem:[#allocation5 + $0x238] sm:$0xff]  ;;  %v591_v30 = vpack.c.bf16 %v229_v23, %v223_v22  ;;  %v222_v31 = vld [vmem:[#allocation5 + $0x5b0] sm:$0xff] }
  0x56   :  { %514 = vmatpush1.bf16.msra.mxu0 %v513_v52  ;;  %568 = vmatprep.subr.bf16.mxu1 %v567_v21  ;;  %v193_v52 = vld [vmem:[#allocation5 + $0x4c8] sm:$0xff]  ;;  %v589_v29 = vpack.c.bf16 %v216_v20, %v210_v19  ;;  %v104_v35 = vld [vmem:[#allocation5 + $0x200] sm:$0xff]  ;;  %v123_v38 = vld [vmem:[#allocation5 + $0x298] sm:$0xff] }
  0x57   :  { %516 = vmatprep.subr.bf16.mxu0 %v515_v55  ;;  %v62_v55 = vld [vmem:[#allocation5 + $0xb0] sm:$0xff]  ;;  %v579_v59 = vpack.c.bf16 %v193_v52, %v187_v51  ;;  %v117_v37 = vld [vmem:[#allocation5 + $0x268] sm:$0xff]  ;;  %v116_v43 = vld [vmem:[#allocation5 + $0x260] sm:$0xff] }
  0x58   :  { %v601_v62 = vpack.c.bf16 %v62_v55, %v56_v54  ;;  %v619_v41 = vpack.c.bf16 %v123_v38, %v117_v37  ;;  %v122_v44 = vld [vmem:[#allocation5 + $0x290] sm:$0xff]  ;;  %v141_v52 = vld [vmem:[#allocation5 + $0x328] sm:$0xff]  ;;  %v140_v56 = vld [vmem:[#allocation5 + $0x320] sm:$0xff] }
  0x59   :  { %570 = vmatpush1.bf16.msra.mxu1 %v569_v32  ;;  %v228_v32 = vld [vmem:[#allocation5 + $0x5e0] sm:$0xff]  ;;  %v621_v47 = vpack.c.bf16 %v122_v44, %v116_v43  ;;  %v134_v51 = vld [vmem:[#allocation5 + $0x2f0] sm:$0xff]  ;;  %v213_v23 = vld [vmem:[#allocation5 + $0x568] sm:$0xff] }
  0x5a   :  { %518 = vmatpush1.bf16.msra.mxu0 %v517_v0  ;;  %572 = vmatprep.subr.bf16.mxu1 %v571_v33  ;;  %v205_v0 = vld [vmem:[#allocation5 + $0x528] sm:$0xff]  ;;  %v613_v33 = vpack.c.bf16 %v98_v26, %v92_v25  ;;  %v146_v57 = vld [vmem:[#allocation5 + $0x350] sm:$0xff]  ;;  %v164_v4 = vld [vmem:[#allocation5 + $0x3e0] sm:$0xff] }
  0x5b   :  { %520 = vmatprep.subr.bf16.mxu0 %v519_v3  ;;  %v74_v3 = vld [vmem:[#allocation5 + $0x110] sm:$0xff]  ;;  %v583_v7 = vpack.c.bf16 %v205_v0, %v199_v63  ;;  %v629_v60 = vpack.c.bf16 %v146_v57, %v140_v56  ;;  %v165_v0 = vld [vmem:[#allocation5 + $0x3e8] sm:$0xff] }
  0x5c   :  { %v605_v10 = vpack.c.bf16 %v74_v3, %v68_v2  ;;  %v158_v63 = vld [vmem:[#allocation5 + $0x3b0] sm:$0xff] }
  0x5d   :  { %574 = vmatpush1.bf16.msra.mxu1 %v573_v45  ;;  %v129_v45 = vld [vmem:[#allocation5 + $0x2c8] sm:$0xff]  ;;  %v170_v5 = vld [vmem:[#allocation5 + $0x410] sm:$0xff] }
  0x5e   :  { %522 = vmatpush1.bf16.msra.mxu0 %v521_v12  ;;  %576 = vmatprep.subr.bf16.mxu1 %v575_v46  ;;  %v217_v12 = vld [vmem:[#allocation5 + $0x588] sm:$0xff]  ;;  %v135_v46 = vld [vmem:[#allocation5 + $0x2f8] sm:$0xff]  ;;  %v637_v8 = vpack.c.bf16 %v170_v5, %v164_v4  ;;  %v206_v22 = vld [vmem:[#allocation5 + $0x530] sm:$0xff] }
  0x5f   :  { %524 = vmatprep.subr.bf16.mxu0 %v523_v15  ;;  %v93_v15 = vld [vmem:[#allocation5 + $0x1a8] sm:$0xff]  ;;  %v587_v18 = vpack.c.bf16 %v217_v12, %v211_v11  ;;  %v623_v48 = vpack.c.bf16 %v135_v46, %v129_v45  ;;  %v182_v11 = vld [vmem:[#allocation5 + $0x470] sm:$0xff] }
  0x60   :  { %v189_v12 = vld [vmem:[#allocation5 + $0x4a8] sm:$0xff] }
  0x61   :  { %578 = vmatpush1.bf16.msra.mxu1 %v577_v58  ;;  %v153_v58 = vld [vmem:[#allocation5 + $0x388] sm:$0xff] }
  0x62   :  { %526 = vmatpush1.bf16.msra.mxu0 %v525_v24  ;;  %580 = vmatprep.subr.bf16.mxu1 %v579_v59  ;;  %v611_v24 = vpack.c.bf16 %v99_v16, %v93_v15  ;;  %v159_v59 = vld [vmem:[#allocation5 + $0x3b8] sm:$0xff]  ;;  %v188_v15 = vld [vmem:[#allocation5 + $0x4a0] sm:$0xff]  ;;  %v194_v16 = vld [vmem:[#allocation5 + $0x4d0] sm:$0xff] }
  0x63   :  { %528 = vmatprep.subr.bf16.mxu0 %v527_v27  ;;  %v105_v27 = vld [vmem:[#allocation5 + $0x208] sm:$0xff]  ;;  %v631_v61 = vpack.c.bf16 %v159_v59, %v153_v58  ;;  %v645_v19 = vpack.c.bf16 %v194_v16, %v188_v15 }
  0x64   :  { %v615_v34 = vpack.c.bf16 %v111_v28, %v105_v27  ;;  %v212_v27 = vld [vmem:[#allocation5 + $0x560] sm:$0xff]  ;;  %v218_v28 = vld [vmem:[#allocation5 + $0x590] sm:$0xff] }
  0x65   :  { %582 = vmatpush1.bf16.msra.mxu1 %v581_v6  ;;  %v177_v6 = vld [vmem:[#allocation5 + $0x448] sm:$0xff] }
  0x66   :  { %530 = vmatpush1.bf16.msra.mxu0 %v529_v36  ;;  %584 = vmatprep.subr.bf16.mxu1 %v583_v7  ;;  %v110_v36 = vld [vmem:[#allocation5 + $0x230] sm:$0xff]  ;;  %v183_v7 = vld [vmem:[#allocation5 + $0x478] sm:$0xff] }
  0x67   :  { %596 = vmatprep.subr.bf16.mxu0 %v595_v39  ;;  %v593_v39 = vpack.c.bf16 %v228_v32, %v222_v31  ;;  %v617_v40 = vpack.c.bf16 %v110_v36, %v104_v35  ;;  %v639_v9 = vpack.c.bf16 %v183_v7, %v177_v6  ;;  %v653_v31 = vpack.c.bf16 %v218_v28, %v212_v27 }
  0x69   :  { %297 = vmatmul.mubr.f32.vlgmr.msra.gmra.mrb[0].mxu0 %v791_v49  ;;  %586 = vmatpush1.bf16.msra.mxu1 %v585_v17  ;;  %v201_v17 = vld [vmem:[#allocation5 + $0x508] sm:$0xff] }
  0x6a   :  { %598 = vmatpush1.bf16.msra.mxu0 %v597_v50  ;;  %438 = vmatprep.mubr.f32.mxu0 %v787_v42  ;;  %v86_v42 = vld [vmem:[#allocation5 + $0x170] sm:$0xff]  ;;  %v128_v50 = vld [vmem:[#allocation5 + $0x2c0] sm:$0xff] }
  0x6b   :  { %600 = vmatprep.subr.bf16.mxu0 %v599_v53  ;;  %v609_v21 = vpack.c.bf16 %v86_v42, %v80_v14  ;;  %588 = vmatprep.subr.bf16.mxu1 %v587_v18  ;;  %v147_v53 = vld [vmem:[#allocation5 + $0x358] sm:$0xff]  ;;  %v625_v54 = vpack.c.bf16 %v134_v51, %v128_v50 }
  0x6c   :  { %v627_v55 = vpack.c.bf16 %v147_v53, %v141_v52  ;;  %v207_v18 = vld [vmem:[#allocation5 + $0x538] sm:$0xff] }
  0x6d   :  { %590 = vmatpush1.bf16.msra.mxu1 %v589_v29  ;;  %v647_v20 = vpack.c.bf16 %v207_v18, %v201_v17  ;;  %v225_v29 = vld [vmem:[#allocation5 + $0x5c8] sm:$0xff] }
  0x6e   :  { %602 = vmatpush1.bf16.msra.mxu0 %v601_v62  ;;  %592 = vmatprep.subr.bf16.mxu1 %v591_v30  ;;  %v152_v62 = vld [vmem:[#allocation5 + $0x380] sm:$0xff]  ;;  %v231_v30 = vld [vmem:[#allocation5 + $0x5f8] sm:$0xff] }
  0x6f   :  { %604 = vmatprep.subr.bf16.mxu0 %v603_v1  ;;  %v171_v1 = vld [vmem:[#allocation5 + $0x418] sm:$0xff]  ;;  %v633_v2 = vpack.c.bf16 %v158_v63, %v152_v62  ;;  %v655_v32 = vpack.c.bf16 %v231_v30, %v225_v29 }
  0x70   :  { %v635_v3 = vpack.c.bf16 %v171_v1, %v165_v0 }
  0x71   :  { %594 = vmatpush1.bf16.msra.mxu1 %v593_v39 }
  0x72   :  { %606 = vmatpush1.bf16.msra.mxu0 %v605_v10  ;;  %v176_v10 = vld [vmem:[#allocation5 + $0x440] sm:$0xff] }
  0x73   :  { %608 = vmatprep.subr.bf16.mxu0 %v607_v13  ;;  %v195_v13 = vld [vmem:[#allocation5 + $0x4d8] sm:$0xff]  ;;  %v641_v14 = vpack.c.bf16 %v182_v11, %v176_v10 }
  0x74   :  { %368 = vmatmul.mubr.f32.vlgmr.msra.gmra.mrb[0].mxu1 %v791_v49  ;;  %v643_v42 = vpack.c.bf16 %v195_v13, %v189_v12 }
  0x76   :  { %610 = vmatpush1.bf16.msra.mxu0 %v609_v21  ;;  %v200_v21 = vld [vmem:[#allocation5 + $0x500] sm:$0xff] }
  0x77   :  { %612 = vmatprep.subr.bf16.mxu0 %v611_v24  ;;  %v219_v24 = vld [vmem:[#allocation5 + $0x598] sm:$0xff]  ;;  %v649_v25 = vpack.c.bf16 %v206_v22, %v200_v21 }
  0x78   :  { %v651_v26 = vpack.c.bf16 %v219_v24, %v213_v23 }
  0x7a   :  { %614 = vmatpush1.bf16.msra.mxu0 %v613_v33  ;;  %v224_v33 = vld [vmem:[#allocation5 + $0x5c0] sm:$0xff] }
  0x7b   :  { %616 = vmatprep.subr.bf16.mxu0 %v615_v34  ;;  %v230_v34 = vld [vmem:[#allocation5 + $0x5f0] sm:$0xff] }
  0x7c   :  { %v657_v35 = vpack.c.bf16 %v230_v34, %v224_v33 }
  0x7e   :  { %618 = vmatpush1.bf16.msra.mxu0 %v617_v40 }
  0x7f   :  { %620 = vmatprep.subr.bf16.mxu0 %v619_v41 }
  0x82   :  { %622 = vmatpush1.bf16.msra.mxu0 %v621_v47 }
  0x83   :  { %624 = vmatprep.subr.bf16.mxu0 %v623_v48 }
  0x86   :  { %626 = vmatpush1.bf16.msra.mxu0 %v625_v54 }
  0x87   :  { %628 = vmatprep.subr.bf16.mxu0 %v627_v55 }
  0x8a   :  { %630 = vmatpush1.bf16.msra.mxu0 %v629_v60 }
  0x8b   :  { %632 = vmatprep.subr.bf16.mxu0 %v631_v61 }
  0x8e   :  { %634 = vmatpush1.bf16.msra.mxu0 %v633_v2 }
  0x8f   :  { %636 = vmatprep.subr.bf16.mxu0 %v635_v3 }
  0x92   :  { %638 = vmatpush1.bf16.msra.mxu0 %v637_v8 }
  0x93   :  { %640 = vmatprep.subr.bf16.mxu0 %v639_v9 }
  0x96   :  { %642 = vmatpush1.bf16.msra.mxu0 %v641_v14 }
  0x97   :  { %644 = vmatprep.subr.bf16.mxu0 %v643_v42 }
  0x9a   :  { %646 = vmatpush1.bf16.msra.mxu0 %v645_v19 }
  0x9b   :  { %648 = vmatprep.subr.bf16.mxu0 %v647_v20 }
  0x9e   :  { %650 = vmatpush1.bf16.msra.mxu0 %v649_v25 }
  0x9f   :  { %652 = vmatprep.subr.bf16.mxu0 %v651_v26 }
  0xa2   :  { %654 = vmatpush1.bf16.msra.mxu0 %v653_v31 }
  0xa3   :  { %656 = vmatprep.subr.bf16.mxu0 %v655_v32 }
  0xa6   :  { %658 = vmatpush1.bf16.msra.mxu0 %v657_v35 }
  0xa9   :  { %439 = vmatmul.mubr.f32.vlgmr.msra.gmra.mrb[2].mxu0 %v791_v49 }
 0x13c   :  { %v298_v36 = vpop.f32.mrb[0].mxu0 }
 0x13d   :  { %445 = vst [vmem:[#allocation7] sm:$0xff] %v298_v36  ;;  %v300_v37 = vpop.f32.mrb[1].mxu0 }
 0x13e   :  { %446 = vst [vmem:[#allocation7 + $0x8] sm:$0xff] %v300_v37 }
 0x147   :  { %v369_v38 = vpop.f32.mrb[0].mxu1 }
 0x148   :  { %447 = vst [vmem:[#allocation7 + $0x10] sm:$0xff] %v369_v38  ;;  %v371_v39 = vpop.f32.mrb[1].mxu1 }
 0x149   :  { %448 = vst [vmem:[#allocation7 + $0x18] sm:$0xff] %v371_v39 }
 0x17c   :  { %v440_v40 = vpop.f32.mrb[2].mxu0 }
 0x17d   :  { %449 = vst [vmem:[#allocation7 + $0x20] sm:$0xff] %v440_v40  ;;  %v442_v41 = vpop.f32.mrb[3].mxu0 }
 0x17e   :  { %450 = vst [vmem:[#allocation7 + $0x28] sm:$0xff] %v442_v41 }
 0x17f   :  { %719 = shalt.err (!%p716_p6)
}
 0x180   :  { %s720_s10 = scalar_lea.hbm %s811_s2, 768 }
 0x181   :  { %p721_p7 = scmp.ne.s32.totalorder %s811_s2, %s720_s10  ;;  %p724_p8 = scmp.lt.u32.totalorder %s720_s10, %s811_s2 }
 0x183   :  { %p726_p9 = pnand %p724_p8, %p721_p7 }
 0x185   :  { %729 = shalt.err (!%p726_p9)
}
 0x186   :  { %460 = dma.vmem_to_hbm [thread:$0]  %s458_s6, 768, %s811_s2, [#allocation4]  }
 0x187   :  { %734 = dma.done.wait [#allocation4], 768  }
 0x188   :  { %735 = vsyncadd [#allocation4], 4294966528 }
 0x189   :  { %464 = vsyncpa [#allocation3], 1 }
 0x18a   :  { %465 = vsyncpa [#allocation6], 1 }
 0x18b   :  { %466 = vsyncpa [#allocation4], 1 }

</bundles_post_ra>
